<compile_context>
chip_gen: v7x
topology: tpu7x:2x2x1
jax: 0.10.0
libtpu: 0.0.40
codegen_flags: <defaults>
</compile_context>

<pallas_src>
import functools
import math

import jax
import jax.numpy as jnp
from jax.experimental import pallas as pl
from jax.experimental.pallas import tpu as pltpu


# ----------------------------------------------------------------------------
# Fused Pallas kernel: N weight-normalized linear layers (+ optional ReLU)
# ----------------------------------------------------------------------------
def _fused_mlp_kernel(*refs, num_layers, apply_relu):
    # refs layout:
    #   refs[0]            : scales  (num_layers,) f32      [SMEM]
    #   refs[1]            : x       (M, dims[0])  f32      [VMEM]
    #   refs[2 + 2*i]      : V_i     (dims[i], dims[i+1])   [VMEM]
    #   refs[3 + 2*i]      : b_i     (1, dims[i+1])         [VMEM]
    #   refs[-1]           : out     (M, dims[-1])          [VMEM]
    scales_ref = refs[0]
    x_ref = refs[1]
    o_ref = refs[-1]

    h = x_ref[...].astype(jnp.float32)
    for i in range(num_layers):                      # static Python loop (unrolled)
        v_ref = refs[2 + 2 * i]
        b_ref = refs[3 + 2 * i]
        # MXU matmul; weight_norm applied as a scalar scale on the output
        # (dot(x, s*V) == s * dot(x, V)), then bias + activation on the VPU.
        h = jnp.dot(h, v_ref[...].astype(jnp.float32),
                    preferred_element_type=jnp.float32)
        h = h * scales_ref[i] + b_ref[...]
        if apply_relu:
            h = jnp.maximum(h, 0.0)
    o_ref[...] = h.astype(o_ref.dtype)


def fused_mlp(x2d, params, *, apply_relu=True):
    """x2d: (M, dims[0]) f32; params: list of (V:(in,out), g:(1,1), b:(1,out))."""
    num_layers = len(params)
    M = x2d.shape[0]
    n_out = params[-1][0].shape[1]

    # Hoisted weight_norm(dim=None) scale: g / ||V||_F  (constant given weights).
    scales = jnp.stack(
        [g.reshape(()) / jnp.linalg.norm(v) for (v, g, b) in params]
    ).astype(jnp.float32)                             # (num_layers,)

    inputs = [scales, x2d]
    for (v, g, b) in params:
        inputs += [v, b]

    vmem = pl.BlockSpec(memory_space=pltpu.MemorySpace.VMEM)
    smem = pl.BlockSpec(memory_space=pltpu.MemorySpace.SMEM)
    in_specs = [smem] + [vmem] * (1 + 2 * num_layers)

    kernel = functools.partial(
        _fused_mlp_kernel, num_layers=num_layers, apply_relu=apply_relu
    )
    return pl.pallas_call(
        kernel,
        out_shape=jax.ShapeDtypeStruct((M, n_out), jnp.float32),
        in_specs=in_specs,
        out_specs=vmem,
    )(*inputs)


# ----------------------------------------------------------------------------
# MLP wrapper (parameter setup + reshape glue is plain JAX)
# ----------------------------------------------------------------------------
def init_mlp_params(key, dims):
    """Deterministic init matching PyTorch nn.Linear + weight_norm(dim=None)."""
    params = []
    for i in range(len(dims) - 1):
        in_dim, out_dim = dims[i], dims[i + 1]
        key, kw, kb = jax.random.split(key, 3)
        bound = 1.0 / math.sqrt(in_dim)
        # PyTorch Linear weight is (out, in); we store V transposed as (in, out).
        v = jax.random.uniform(kw, (in_dim, out_dim), jnp.float32, -bound, bound)
        b = jax.random.uniform(kb, (1, out_dim), jnp.float32, -bound, bound)
        # weight_norm init sets g = ||V||_F so the initial effective weight == V.
        g = jnp.linalg.norm(v).reshape(1, 1).astype(jnp.float32)
        params.append((v, g, b))
    return params


def mlp_forward(params, x, act="ReLU", dropout_r=0.0):
    """x: (..., dims[0]) -> (..., dims[-1]).  Matches MLP.forward (eval)."""
    # dropout_r == 0 in this config -> no Dropout layers are constructed.
    # TODO(synk): training-mode dropout (dropout_r > 0) not implemented in-kernel.
    lead_shape = x.shape[:-1]
    h = x.reshape(-1, x.shape[-1])
    out = fused_mlp(h, params, apply_relu=(act != ""))
    return out.reshape(*lead_shape, out.shape[-1])


# ----------------------------------------------------------------------------
# Reference (pure JAX) for a sanity check
# ----------------------------------------------------------------------------
def mlp_reference(params, x, act="ReLU"):
    h = x.reshape(-1, x.shape[-1])
    for (v, g, b) in params:
        w = v * (g[0, 0] / jnp.linalg.norm(v))
        h = h @ w + b
        if act != "":
            h = jnp.maximum(h, 0.0)
    return h.reshape(*x.shape[:-1], h.shape[-1])


if __name__ == "__main__":
    key = jax.random.PRNGKey(0)
    kx, kp = jax.random.split(key)

    # MLP(dims=[32, 64, 32], act='ReLU', dropout_r=0.0)
    dims = [32, 64, 32]
    batch, seq = 2, 8
    x = jax.random.normal(kx, (batch, seq, dims[0]), jnp.float32)

    params = init_mlp_params(kp, dims)

    out = mlp_forward(params, x)
    out = jax.block_until_ready(out)

    ref = mlp_reference(params, x)
    assert out.shape == (batch, seq, dims[-1])
    assert jnp.allclose(out, ref, atol=1e-4, rtol=1e-4), "mismatch vs reference"

    print("KERNEL_OK")
</pallas_src>

<mosaic_0001>
module attributes {stable_mosaic.version = 11 : i64} {
  func.func @_fused_mlp_kernel(%arg0: memref<2xf32, #tpu.memory_space<smem>>, %arg1: memref<16x32xf32, #tpu.memory_space<vmem>>, %arg2: memref<32x64xf32, #tpu.memory_space<vmem>>, %arg3: memref<1x64xf32, #tpu.memory_space<vmem>>, %arg4: memref<64x32xf32, #tpu.memory_space<vmem>>, %arg5: memref<1x32xf32, #tpu.memory_space<vmem>>, %arg6: memref<16x32xf32, #tpu.memory_space<vmem>>) attributes {dimension_semantics = [], scalar_prefetch = 0 : i64, scratch_operands = 0 : i64, tpu.core_type = #tpu.core_type<tc>} {
    %c0 = arith.constant 0 : index
    %c0_0 = arith.constant 0 : index
    %0 = vector.load %arg1[%c0, %c0_0] : memref<16x32xf32, #tpu.memory_space<vmem>>, vector<16x32xf32>
    %c0_1 = arith.constant 0 : index
    %c0_2 = arith.constant 0 : index
    %1 = vector.load %arg2[%c0_1, %c0_2] : memref<32x64xf32, #tpu.memory_space<vmem>>, vector<32x64xf32>
    %cst = arith.constant dense<0.000000e+00> : vector<16x64xf32>
    %2 = tpu.matmul %0, %1, %cst {dimension_numbers = #tpu.dot_dimension_numbers<[1], [0], [0], [1], [0, 0, 1, 1], [], []>} : vector<16x32xf32>, vector<32x64xf32>, vector<16x64xf32> -> vector<16x64xf32>
    %c0_3 = arith.constant 0 : index
    %3 = memref.load %arg0[%c0_3] : memref<2xf32, #tpu.memory_space<smem>>
    %4 = vector.broadcast %3 : f32 to vector<16x64xf32>
    %5 = arith.mulf %2, %4 : vector<16x64xf32>
    %c0_4 = arith.constant 0 : index
    %c0_5 = arith.constant 0 : index
    %6 = vector.load %arg3[%c0_4, %c0_5] : memref<1x64xf32, #tpu.memory_space<vmem>>, vector<1x64xf32>
    %7 = vector.broadcast %6 : vector<1x64xf32> to vector<16x64xf32>
    %8 = arith.addf %5, %7 : vector<16x64xf32>
    %cst_6 = arith.constant 0.000000e+00 : f32
    %9 = vector.broadcast %cst_6 : f32 to vector<16x64xf32>
    %10 = arith.maximumf %8, %9 : vector<16x64xf32>
    %c0_7 = arith.constant 0 : index
    %c0_8 = arith.constant 0 : index
    %11 = vector.load %arg4[%c0_7, %c0_8] : memref<64x32xf32, #tpu.memory_space<vmem>>, vector<64x32xf32>
    %cst_9 = arith.constant dense<0.000000e+00> : vector<16x32xf32>
    %12 = tpu.matmul %10, %11, %cst_9 {dimension_numbers = #tpu.dot_dimension_numbers<[1], [0], [0], [1], [0, 0, 1, 1], [], []>} : vector<16x64xf32>, vector<64x32xf32>, vector<16x32xf32> -> vector<16x32xf32>
    %c1 = arith.constant 1 : index
    %13 = memref.load %arg0[%c1] : memref<2xf32, #tpu.memory_space<smem>>
    %14 = vector.broadcast %13 : f32 to vector<16x32xf32>
    %15 = arith.mulf %12, %14 : vector<16x32xf32>
    %c0_10 = arith.constant 0 : index
    %c0_11 = arith.constant 0 : index
    %16 = vector.load %arg5[%c0_10, %c0_11] : memref<1x32xf32, #tpu.memory_space<vmem>>, vector<1x32xf32>
    %17 = vector.broadcast %16 : vector<1x32xf32> to vector<16x32xf32>
    %18 = arith.addf %15, %17 : vector<16x32xf32>
    %cst_12 = arith.constant 0.000000e+00 : f32
    %19 = vector.broadcast %cst_12 : f32 to vector<16x32xf32>
    %20 = arith.maximumf %18, %19 : vector<16x32xf32>
    %c0_13 = arith.constant 0 : index
    %c0_14 = arith.constant 0 : index
    %21 = vector.load %arg6[%c0_13, %c0_14] : memref<16x32xf32, #tpu.memory_space<vmem>>, vector<16x32xf32>
    tpu.vector_store %arg6[%c0_13, %c0_14], %20 {strides = array<i32>} : memref<16x32xf32, #tpu.memory_space<vmem>>, vector<16x32xf32>,
    return
  }
}

</mosaic_0001>

<bundles_post_ra>
// kernel: tpu_custom_call.1
= control target key start
LH: loop header
LB: loop body
LE: loop exit
PB: predicated region body
PF: predicated region fallthrough
CT: control target
= control target key end

     0   :  { %11 = vsyncpa [#allocation4], 0  ;;  %s489_s0 = inlined_call_operand.vmem [shape: f32[2], index: 0, kind: input, shape index: {}]   ;;  %s490_s1 = inlined_call_operand.vmem [shape: f32[16,32], index: 1, kind: input, shape index: {}]   ;;  %s491_s2 = inlined_call_operand.vmem [shape: f32[32,64], index: 2, kind: input, shape index: {}]   ;;  %s492_s3 = inlined_call_operand.vmem [shape: f32[1,64], index: 3, kind: input, shape index: {}]   ;;  %s493_s4 = inlined_call_operand.vmem [shape: f32[64,32], index: 4, kind: input, shape index: {}]   ;;  %s494_s5 = inlined_call_operand.vmem [shape: f32[1,32], index: 5, kind: input, shape index: {}]   ;;  %s495_s6 = inlined_call_operand.hbm [shape: f32[16,32], index: 6, kind: output, shape index: {}]  }
   0x1   :  { %12 = vsyncpa [#allocation3], 0  ;;  %s19_s23 = sshll.u32 %s489_s0, 4  ;;  %s20_s23 = int_to_ptr.vmem [resolvable:$true] %s19_s23 }
   0x2   :  { %s345_s24 = scalar_lea.vmem %s20_s23, 16  ;;  %p350_p1 = scmp.lt.s32.totalorder %s20_s23, %s20_s23 }
   0x3   :  { %p346_p0 = scmp.ne.s32.totalorder %s20_s23, %s345_s24  ;;  %p351_p2 = scmp.lt.s32.totalorder %s345_s24, %s345_s24 }
   0x5   :  { %p352_p3 = por %p351_p2, %p350_p1 }
   0x7   :  { %p353_p4 = pnand %p352_p3, %p346_p0 }
   0x9   :  { %356 = shalt.err (!%p353_p4)
}
   0xa   :  { %s383_s25 = smov [#allocation2]  }
   0xb   :  { %22 = dma.vmem_to_smem %s20_s23, 16, %s383_s25, [#allocation4]  }
   0xc   :  { %379 = dma.done.wait [#allocation4], 16  }
   0xd   :  { %380 = vsyncadd [#allocation4], 4294967280 }
   0xe   :  { %36 = sfence }
   0xf   :  { %v39_v0 = vld [vmem:[%s491_s2] sm:$0xff]  ;;  %v40_v1 = vld [vmem:[%s491_s2 + $0x8] sm:$0xff]  ;;  %v41_v2 = vld [vmem:[%s491_s2 + $0x10] sm:$0xff]  ;;  %vm43_vm0 = vcmask 261120   ;;  %s125_s27 = sld [smem:[#allocation2]]  ;;  %vm148_vm1 = vcmask 523264  }
  0x10   :  { %v317_v3 = vpack.c.bf16 %v40_v1, %v39_v0  ;;  %v42_v4 = vld [vmem:[%s491_s2 + $0x18] sm:$0xff]  ;;  %v37_v5 = vld [vmem:[%s490_s1] sm:$0xff]  ;;  %v141_v8 = vld [vmem:[%s493_s4 + $0x8] sm:$0xff] }
  0x11   :  { %v321_v6 = vpack.c.bf16 %v42_v4, %v41_v2  ;;  %295 = vmatprep.mubr.msk.f32.mxu0 %vm43_vm0, %v37_v5  ;;  %v140_v7 = vld [vmem:[%s493_s4] sm:$0xff]  ;;  %v142_v9 = vld [vmem:[%s493_s4 + $0x10] sm:$0xff]  ;;  %v143_v11 = vld [vmem:[%s493_s4 + $0x18] sm:$0xff] }
  0x12   :  { %318 = vmatprep.subr.bf16.mxu0 %v317_v3  ;;  %v325_v10 = vpack.c.bf16 %v141_v8, %v140_v7  ;;  %v329_v12 = vpack.c.bf16 %v143_v11, %v142_v9  ;;  %v38_v13 = vld [vmem:[%s490_s1 + $0x8] sm:$0xff]  ;;  %v144_v14 = vld [vmem:[%s493_s4 + $0x20] sm:$0xff]  ;;  %v146_v17 = vld [vmem:[%s493_s4 + $0x30] sm:$0xff] }
  0x13   :  { %320 = vmatpush3.bf16.msra.mxu0 %v317_v3  ;;  %v145_v15 = vld [vmem:[%s493_s4 + $0x28] sm:$0xff]  ;;  %v147_v18 = vld [vmem:[%s493_s4 + $0x38] sm:$0xff]  ;;  %v266_v22 = vld [vmem:[%s492_s3] ss:$0 sm:$0xff]  ;;  %s269_s4 = sld [smem:[#allocation2 + $0x1]]  ;;  %s384_s3 = smov [#allocation5]  }
  0x14   :  { %322 = vmatprep.subr.bf16.mxu0 %v321_v6  ;;  %326 = vmatprep.subr.bf16.mxu1 %v325_v10  ;;  %v333_v16 = vpack.c.bf16 %v145_v15, %v144_v14  ;;  %v337_v19 = vpack.c.bf16 %v147_v18, %v146_v17  ;;  %v270_v32 = vld [vmem:[%s494_s5] ss:$0 sm:$0xff]  ;;  %s252_s7 = sshll.u32 %s384_s3, 4  ;;  %s253_s7 = int_to_ptr.vmem [resolvable:$true] %s252_s7 }
  0x15   :  { %328 = vmatpush3.bf16.msra.mxu1 %v325_v10  ;;  %v126_v20 = vstv %s125_s27  ;;  %s357_s8 = scalar_lea.vmem %s253_s7, 256  ;;  %p362_p6 = scmp.lt.s32.totalorder %s253_s7, %s253_s7 }
  0x16   :  { %330 = vmatprep.subr.bf16.mxu1 %v329_v12  ;;  %p358_p5 = scmp.ne.s32.totalorder %s253_s7, %s357_s8  ;;  %p363_p7 = scmp.lt.s32.totalorder %s357_s8, %s357_s8 }
  0x17   :  { %324 = vmatpush3.bf16.msra.mxu0 %v321_v6 }
  0x18   :  { %p364_p8 = por %p363_p7, %p362_p6 }
  0x19   :  { %332 = vmatpush3.bf16.msra.mxu1 %v329_v12  ;;  %v231_v30 = vstv %s269_s4 }
  0x1a   :  { %296 = vmatmul.mubr.msk.f32.vlgmr.msra.gmra.mrb[0].mxu0 %vm43_vm0, %v38_v13  ;;  %334 = vmatprep.subr.bf16.mxu1 %v333_v16  ;;  %p365_p9 = pnand %p364_p8, %p358_p5 }
  0x1d   :  { %336 = vmatpush3.bf16.msra.mxu1 %v333_v16 }
  0x1e   :  { %338 = vmatprep.subr.bf16.mxu1 %v337_v19 }
  0x21   :  { %340 = vmatpush3.bf16.msra.mxu1 %v337_v19 }
  0xed   :  { %v297_v21 = vpop.f32.mrb[0].mxu0 }
  0xee   :  { %v128_v23 = vmul.f32 %v297_v21, %v126_v20  ;;  %v116_v24 = vpop.f32.mrb[1].mxu0 }
  0xef   :  { %v127_v25 = vmul.f32 %v126_v20, %v116_v24 }
  0xf0   :  { %v137_v26 = vadd.f32 %v266_v22, %v128_v23 }
  0xf1   :  { %v136_v27 = vadd.f32 %v266_v22, %v127_v25 }
  0xf2   :  { %v139_v29 = vmax.f32 %v137_v26, 0.0 }
  0xf3   :  { %v138_v28 = vmax.f32 %v136_v27, 0.0 }
  0xf5   :  { %314 = vmatprep.mubr.msk.f32.mxu1 %vm148_vm1, %v138_v28 }
  0xf6   :  { %315 = vmatmul.mubr.msk.f32.vlgmr.msra.gmra.mrb[0].mxu1 %vm148_vm1, %v139_v29 }
 0x1c9   :  { %v316_v31 = vpop.f32.mrb[0].mxu1 }
 0x1ca   :  { %v233_v33 = vmul.f32 %v316_v31, %v231_v30  ;;  %v221_v34 = vpop.f32.mrb[1].mxu1 }
 0x1cb   :  { %v232_v35 = vmul.f32 %v231_v30, %v221_v34 }
 0x1cc   :  { %v242_v36 = vadd.f32 %v270_v32, %v233_v33 }
 0x1cd   :  { %v241_v37 = vadd.f32 %v270_v32, %v232_v35 }
 0x1ce   :  { %v244_v38 = vmax.f32 %v242_v36, 0.0 }
 0x1cf   :  { %v243_v39 = vmax.f32 %v241_v37, 0.0 }
 0x1d0   :  { %246 = vst.msk [vmem:[#allocation5 + $0x8] sm:$0xff] %vm43_vm0, %v244_v38 }
 0x1d1   :  { %245 = vst.msk [vmem:[#allocation5] sm:$0xff] %vm43_vm0, %v243_v39 }
 0x1d2   :  { %368 = shalt.err (!%p365_p9)
}
 0x1d3   :  { %s369_s10 = scalar_lea.hbm %s495_s6, 256 }
 0x1d4   :  { %p370_p10 = scmp.ne.s32.totalorder %s495_s6, %s369_s10  ;;  %p373_p11 = scmp.lt.u32.totalorder %s369_s10, %s495_s6 }
 0x1d6   :  { %p375_p12 = pnand %p373_p11, %p370_p10 }
 0x1d8   :  { %378 = shalt.err (!%p375_p12)
}
 0x1d9   :  { %s385_s15 = smov 128   ;;  %s386_s16 = smov 8  }
 0x1da   :  { %258 = dma.vmem_to_hbm [thread:$0]  %s253_s7, 256, %s495_s6, [#allocation3], %s385_s15, %s385_s15, %s386_s16  }
 0x1db   :  { %381 = dma.done.wait [#allocation3], 256  }
 0x1dc   :  { %382 = vsyncadd [#allocation3], 4294967040 }
 0x1dd   :  { %262 = vsyncpa [#allocation3], 1 }
 0x1de   :  { %263 = vsyncpa [#allocation4], 1 }

</bundles_post_ra>
